<compile_context>
chip_gen: v7x
topology: tpu7x:2x2x1
jax: 0.10.0
libtpu: 0.0.40
codegen_flags: <defaults>
</compile_context>

<pallas_src>
import functools

import jax
import jax.numpy as jnp
from jax import lax
from jax.experimental import pallas as pl
from jax.experimental.pallas import tpu as pltpu

_SUBLANES = 8
_MIN_LANES = 128


def _round_up(x, m):
    return ((x + m - 1) // m) * m


def _pick_modulus():
    """256-wide modulus on the 256x256-MXU generations (v6e/v7x), else 128."""
    try:
        kind = jax.devices()[0].device_kind.lower()
    except Exception:
        return 128
    if ("v6" in kind) or ("v7" in kind):
        return 256
    return 128


def _vmem_limit_bytes():
    """Generation-aware VMEM cap: ~75% of physical, conservative fallback."""
    phys = 64 * 1024 * 1024          # v7x floor if the query fails
    try:
        phys = int(pltpu.get_tpu_info().vmem_capacity_bytes)
    except Exception:
        pass
    return max(16 * 1024 * 1024, (phys * 3) // 4)


def _pick_split_terms(items_cnts):
    """2 bf16 terms reconstruct counts exactly for |counts| < 2**16; 3 for any f32."""
    try:
        m = float(jnp.max(jnp.abs(items_cnts)))
        return 2 if m < 65536.0 else 3
    except Exception:                 # tracer under jit: be conservative
        return 3


def _split_counts_bf16(counts2d, terms):
    """Split f32 counts into `terms` bf16 slabs whose f32 sum is exact."""
    parts = []
    resid = counts2d
    for _ in range(terms):
        p = resid.astype(jnp.bfloat16)
        parts.append(p)
        resid = resid - p.astype(jnp.float32)
    return jnp.stack(parts, axis=0)   # (terms, KI, MOD) bf16


def _toppop_resident_kernel(ids_ref, counts_ref, out_ref, *, modulus, shift, terms):
    # ids_ref:    (1, BP)               int32  lane-dense tile of flattened ids
    # counts_ref: (terms, KI, modulus)  bf16   full table (VMEM-resident, DMA'd once)
    # out_ref:    (1, BP)               f32    lane-dense output tile
    ids = ids_ref[...]
    bp = ids.shape[1]
    ki = counts_ref.shape[1]

    rem = ids & (modulus - 1)                                     # id % MOD
    q = ids >> shift                                              # id // MOD

    c_iota = lax.broadcasted_iota(jnp.int32, (modulus, bp), 0)
    onehot = (c_iota == rem).astype(jnp.bfloat16)                 # exact 0/1

    # Stage 1 (MXU): 2-3 single-pass bf16 dots, f32 accumulation (exact gather).
    colvals = jnp.dot(counts_ref[0], onehot, preferred_element_type=jnp.float32)
    for t in range(1, terms):
        colvals = colvals + jnp.dot(counts_ref[t], onehot,
                                    preferred_element_type=jnp.float32)

    # Stage 2 (VPU): pick the row matching q[j].
    row_iota = lax.broadcasted_iota(jnp.int32, (ki, bp), 0)
    picked = jnp.where(row_iota == q, colvals, 0.0)
    out_ref[...] = jnp.sum(picked, axis=0, keepdims=True)


def _toppop_streamed_kernel(ids_ref, counts_ref, out_ref, onehot_ref, *,
                            modulus, shift, terms):
    # ids_ref:    (1, BP)               int32
    # counts_ref: (terms, TK, modulus)  bf16   k-th tile of the packed table
    # out_ref:    (1, BP)               f32    resident accumulator over k
    # onehot_ref: (modulus, BP)         bf16   scratch, built once per j tile
    k_idx = pl.program_id(1)
    tk = counts_ref.shape[1]
    bp = ids_ref.shape[1]

    @pl.when(k_idx == 0)
    def _init():
        out_ref[...] = jnp.zeros_like(out_ref)
        rem = ids_ref[...] & (modulus - 1)
        c_iota = lax.broadcasted_iota(jnp.int32, (modulus, bp), 0)
        onehot_ref[...] = (c_iota == rem).astype(jnp.bfloat16)

    # Hoisted iota arithmetic: a (1,bp) subtract on q instead of adding
    # k_idx*tk to a (tk,bp) iota every k step.
    q_local = (ids_ref[...] >> shift) - k_idx * tk

    onehot = onehot_ref[...]
    colvals = jnp.dot(counts_ref[0], onehot, preferred_element_type=jnp.float32)
    for t in range(1, terms):
        colvals = colvals + jnp.dot(counts_ref[t], onehot,
                                    preferred_element_type=jnp.float32)

    row_iota = lax.broadcasted_iota(jnp.int32, (tk, bp), 0)
    picked = jnp.where(row_iota == q_local, colvals, 0.0)
    out_ref[...] += jnp.sum(picked, axis=0, keepdims=True)


def toppopular_forward(items_cnts, item_ids, get_l2_reg=False, *,
                       block_p=None, block_k=None, modulus=None,
                       count_split_terms=None, resident=None):
    """JAX/Pallas equivalent of TopPopular.forward: items_cnts[item_ids].

    items_cnts: (ITEM_NUM,) popularity counts (the "pretrained" table).
    item_ids:   int array of item indices (any shape), values in [0, ITEM_NUM).
                Out-of-range / negative ids yield 0.0.
    """
    items_cnts = jnp.asarray(items_cnts, dtype=jnp.float32)
    item_ids = jnp.asarray(item_ids, dtype=jnp.int32)
    orig_shape = item_ids.shape
    r = int(item_ids.size)
    item_num = int(items_cnts.shape[0])

    if r == 0:
        result = jnp.zeros(orig_shape, dtype=jnp.float32)
        return (result, jnp.zeros((), jnp.float32)) if get_l2_reg else result

    modulus = int(modulus) if modulus is not None else _pick_modulus()
    shift = modulus.bit_length() - 1
    terms = (int(count_split_terms) if count_split_terms is not None
             else _pick_split_terms(items_cnts))

    # Counts packed across sublanes: counts2d[k, c] = items_cnts[k*MOD + c],
    # split into `terms` bf16 slabs whose sum is exactly the f32 counts.
    ki = max(_round_up(pl.cdiv(item_num, modulus), _SUBLANES), _SUBLANES)
    counts_flat = jnp.pad(items_cnts, (0, ki * modulus - item_num))
    counts_split = _split_counts_bf16(counts_flat.reshape(ki, modulus), terms)

    vmem_limit = _vmem_limit_bytes()
    table_bytes = int(counts_split.size) * 2   # bf16

    if resident is None:
        # Resident when the (double-buffered) table comfortably fits VMEM and
        # the single-pass colvals intermediate stays small.
        resident = (2 * table_bytes <= min(24 * 1024 * 1024, vmem_limit // 3)
                    and ki <= 1024)
    resident = bool(resident)

    # Lane-dense (1, R_pad) row of flattened ids; padded ids gather index 0
    # and are sliced away after the call.  Output last dim is a 128-multiple
    # (unmasked vst stores).
    r_lanes = _round_up(r, _MIN_LANES)
    if resident:
        bp = _round_up(min(block_p if block_p is not None else 512, r_lanes),
                       _MIN_LANES)
        if r >= 2 * _MIN_LANES:
            # >=2 position tiles so the "parallel" axis feeds both v7x TCs.
            bp = min(bp, _round_up(pl.cdiv(r, 2), _MIN_LANES))
    else:
        bp = _round_up(min(block_p if block_p is not None else 1024, r_lanes),
                       _MIN_LANES)
    bp = max(bp, _MIN_LANES)
    r_pad = _round_up(r, bp)
    ids_row = jnp.pad(item_ids.reshape(-1), (0, r_pad - r)).reshape(1, r_pad)

    kernel_kwargs = dict(modulus=modulus, shift=shift, terms=terms)

    if resident:
        grid = (r_pad // bp,)
        cost = pl.CostEstimate(
            flops=2 * terms * r_pad * ki * modulus,
            transcendentals=0,
            bytes_accessed=4 * r_pad + table_bytes + 4 * r_pad,
        )
        out = pl.pallas_call(
            functools.partial(_toppop_resident_kernel, **kernel_kwargs),
            out_shape=jax.ShapeDtypeStruct((1, r_pad), jnp.float32),
            grid_spec=pltpu.PrefetchScalarGridSpec(
                num_scalar_prefetch=0,
                grid=grid,
                in_specs=[
                    pl.BlockSpec((1, bp), lambda j: (0, j)),
                    # Constant block index: the table is DMA'd to VMEM once.
                    pl.BlockSpec((terms, ki, modulus), lambda j: (0, 0, 0)),
                ],
                out_specs=pl.BlockSpec((1, bp), lambda j: (0, j)),
            ),
            compiler_params=pltpu.CompilerParams(
                dimension_semantics=("parallel",),
                vmem_limit_bytes=vmem_limit,
            ),
            cost_estimate=cost,
        )(ids_row, counts_split)
    else:
        tk = _round_up(min(block_k if block_k is not None else 256, ki),
                       _SUBLANES)
        ki_pad = _round_up(ki, tk)
        if ki_pad != ki:
            counts_split = jnp.pad(counts_split,
                                   ((0, 0), (0, ki_pad - ki), (0, 0)))
        grid = (r_pad // bp, ki_pad // tk)   # (position tiles, k reduction)
        cost = pl.CostEstimate(
            flops=2 * terms * r_pad * ki_pad * modulus,
            transcendentals=0,
            bytes_accessed=(4 * r_pad
                            + int(counts_split.size) * 2 * (r_pad // bp)
                            + 4 * r_pad),
        )
        out = pl.pallas_call(
            functools.partial(_toppop_streamed_kernel, **kernel_kwargs),
            out_shape=jax.ShapeDtypeStruct((1, r_pad), jnp.float32),
            grid_spec=pltpu.PrefetchScalarGridSpec(
                num_scalar_prefetch=0,
                grid=grid,
                in_specs=[
                    pl.BlockSpec((1, bp), lambda j, k: (0, j)),
                    pl.BlockSpec((terms, tk, modulus), lambda j, k: (0, k, 0)),
                ],
                out_specs=pl.BlockSpec((1, bp), lambda j, k: (0, j)),
                scratch_shapes=[pltpu.VMEM((modulus, bp), jnp.bfloat16)],
            ),
            compiler_params=pltpu.CompilerParams(
                dimension_semantics=("parallel", "arbitrary"),
                vmem_limit_bytes=vmem_limit,
            ),
            cost_estimate=cost,
        )(ids_row, counts_split)

    result = out[0, :r].reshape(orig_shape)

    if get_l2_reg:
        # TopPopular's l2 regularizer is the constant 0; float32 so it composes
        # cleanly with a float loss.
        return result, jnp.zeros((), dtype=jnp.float32)
    return result


def predict_for_user(items_cnts, user_id=None):
    # TopPopular.predict_for_user just returns the full popularity table.
    return items_cnts


if __name__ == "__main__":
    key = jax.random.PRNGKey(0)
    k_cnt, k_ids, k_cnt2, k_ids2 = jax.random.split(key, 4)

    # --- small case matching the module's toy usage (resident fast path) ----
    item_num, batch, n_items = 128, 2, 8
    items_cnts = jax.random.randint(
        k_cnt, (item_num,), minval=0, maxval=100, dtype=jnp.int32
    ).astype(jnp.float32)
    item_ids = jax.random.randint(
        k_ids, (batch, n_items), minval=0, maxval=item_num, dtype=jnp.int32)

    out = jax.block_until_ready(toppopular_forward(items_cnts, item_ids))
    ref = items_cnts[item_ids]
    assert out.shape == (batch, n_items)
    assert jnp.allclose(out, ref), (out, ref)

    # get_l2_reg path (float32 zero regularizer)
    out2, l2 = toppopular_forward(items_cnts, item_ids, get_l2_reg=True)
    jax.block_until_ready(out2)
    assert jnp.allclose(out2, ref)
    assert float(l2) == 0.0 and l2.dtype == jnp.float32

    # --- larger catalog: exercise the streamed path (multiple parallel
    #     position tiles + k-reduction accumulation) and padding/slicing ------
    item_num2, batch2, n_items2 = 4096, 3, 200
    items_cnts2 = jax.random.randint(
        k_cnt2, (item_num2,), minval=0, maxval=1000, dtype=jnp.int32
    ).astype(jnp.float32)
    item_ids2 = jax.random.randint(
        k_ids2, (batch2, n_items2), minval=0, maxval=item_num2, dtype=jnp.int32)
    ref2 = items_cnts2[item_ids2]

    out3 = jax.block_until_ready(
        toppopular_forward(items_cnts2, item_ids2,
                           block_p=128, block_k=8, resident=False))
    assert jnp.allclose(out3, ref2), "streamed path mismatch"

    # --- same catalog through the auto-dispatched resident path --------------
    out4 = jax.block_until_ready(toppopular_forward(items_cnts2, item_ids2))
    assert jnp.allclose(out4, ref2), "resident path mismatch"

    print("KERNEL_OK")
</pallas_src>

<mosaic_0001>
module attributes {stable_mosaic.version = 11 : i64} {
  func.func @_toppop_resident_kernel(%arg0: i32, %arg1: memref<1x128xi32, #tpu.memory_space<vmem>>, %arg2: memref<2x8x128xbf16, #tpu.memory_space<vmem>>, %arg3: memref<1x128xf32, #tpu.memory_space<vmem>>) attributes {dimension_semantics = [#tpu.dimension_semantics<parallel>], iteration_bounds = array<i64: 1>, scalar_prefetch = 0 : i64, scratch_operands = 0 : i64, tpu.core_type = #tpu.core_type<tc>, window_params = [{transform_indices = @transform_0, window_bounds = array<i64: 1, 128>}, {pipeline_mode = #tpu.pipeline_mode<synchronous>, transform_indices = @transform_1, window_bounds = array<i64: 2, 8, 128>}, {transform_indices = @transform_2, window_bounds = array<i64: 1, 128>}]} {
    %c0 = arith.constant 0 : index
    %c0_0 = arith.constant 0 : index
    %0 = vector.load %arg1[%c0, %c0_0] : memref<1x128xi32, #tpu.memory_space<vmem>>, vector<1x128xi32>
    %c127_i32 = arith.constant 127 : i32
    %1 = vector.broadcast %c127_i32 : i32 to vector<1x128xi32>
    %2 = arith.andi %0, %1 : vector<1x128xi32>
    %c7_i32 = arith.constant 7 : i32
    %3 = vector.broadcast %c7_i32 : i32 to vector<1x128xi32>
    %4 = arith.shrsi %0, %3 : vector<1x128xi32>
    %5 = tpu.iota {dimensions = array<i32: 0>} : vector<128x128xi32>
    %6 = vector.broadcast %2 : vector<1x128xi32> to vector<128x128xi32>
    %7 = arith.cmpi eq, %5, %6 : vector<128x128xi32>
    %8 = arith.extui %7 : vector<128x128xi1> to vector<128x128xi32>
    %9 = arith.sitofp %8 : vector<128x128xi32> to vector<128x128xf32>
    %10 = arith.truncf %9 : vector<128x128xf32> to vector<128x128xbf16>
    %c0_1 = arith.constant 0 : index
    %c0_2 = arith.constant 0 : index
    %c0_3 = arith.constant 0 : index
    %11 = vector.load %arg2[%c0_1, %c0_2, %c0_3] : memref<2x8x128xbf16, #tpu.memory_space<vmem>>, vector<1x8x128xbf16>
    %12 = vector.shape_cast %11 : vector<1x8x128xbf16> to vector<8x128xbf16>
    %cst = arith.constant dense<0.000000e+00> : vector<8x128xf32>
    %13 = tpu.matmul %12, %10, %cst {dimension_numbers = #tpu.dot_dimension_numbers<[1], [0], [0], [1], [0, 0, 1, 1], [], []>} : vector<8x128xbf16>, vector<128x128xbf16>, vector<8x128xf32> -> vector<8x128xf32>
    %c1 = arith.constant 1 : index
    %c0_4 = arith.constant 0 : index
    %c0_5 = arith.constant 0 : index
    %14 = vector.load %arg2[%c1, %c0_4, %c0_5] : memref<2x8x128xbf16, #tpu.memory_space<vmem>>, vector<1x8x128xbf16>
    %15 = vector.shape_cast %14 : vector<1x8x128xbf16> to vector<8x128xbf16>
    %cst_6 = arith.constant dense<0.000000e+00> : vector<8x128xf32>
    %16 = tpu.matmul %15, %10, %cst_6 {dimension_numbers = #tpu.dot_dimension_numbers<[1], [0], [0], [1], [0, 0, 1, 1], [], []>} : vector<8x128xbf16>, vector<128x128xbf16>, vector<8x128xf32> -> vector<8x128xf32>
    %17 = arith.addf %13, %16 : vector<8x128xf32>
    %18 = tpu.iota {dimensions = array<i32: 0>} : vector<8x128xi32>
    %19 = vector.broadcast %4 : vector<1x128xi32> to vector<8x128xi32>
    %20 = arith.cmpi eq, %18, %19 : vector<8x128xi32>
    %cst_7 = arith.constant 0.000000e+00 : f32
    %21 = vector.broadcast %cst_7 : f32 to vector<8x128xf32>
    %22 = arith.select %20, %17, %21 : vector<8x128xi1>, vector<8x128xf32>
    %cst_8 = arith.constant dense<0.000000e+00> : vector<128xf32>
    %23 = vector.multi_reduction <add>, %22, %cst_8 [0] : vector<8x128xf32> to vector<128xf32>
    %24 = vector.shape_cast %23 : vector<128xf32> to vector<1x128xf32>
    %c0_9 = arith.constant 0 : index
    %c0_10 = arith.constant 0 : index
    %25 = vector.load %arg3[%c0_9, %c0_10] : memref<1x128xf32, #tpu.memory_space<vmem>>, vector<1x128xf32>
    tpu.vector_store %arg3[%c0_9, %c0_10], %24 {strides = array<i32>} : memref<1x128xf32, #tpu.memory_space<vmem>>, vector<1x128xf32>,
    return
  }
  func.func @transform_0(%arg0: i32) -> (i32, i32) {
    %c0_i32 = arith.constant 0 : i32
    %c0_i32_0 = arith.constant 0 : i32
    return %c0_i32, %arg0 : i32, i32
  }
  func.func @transform_1(%arg0: i32) -> (i32, i32, i32) {
    %c0_i32 = arith.constant 0 : i32
    %c0_i32_0 = arith.constant 0 : i32
    %c0_i32_1 = arith.constant 0 : i32
    %c0_i32_2 = arith.constant 0 : i32
    return %c0_i32, %c0_i32_0, %c0_i32_1 : i32, i32, i32
  }
  func.func @transform_2(%arg0: i32) -> (i32, i32) {
    %c0_i32 = arith.constant 0 : i32
    %c0_i32_0 = arith.constant 0 : i32
    return %c0_i32, %arg0 : i32, i32
  }
}

</mosaic_0001>

<bundles_post_ra>
// kernel: tpu_custom_call.1
= control target key start
LH: loop header
LB: loop body
LE: loop exit
PB: predicated region body
PF: predicated region fallthrough
CT: control target
= control target key end

     0   :  { %7 = vsyncpa [#allocation3], 0  ;;  %s548_s0 = inlined_call_operand.hbm [shape: s32[1,128], index: 0, kind: input, shape index: {}]   ;;  %s549_s1 = inlined_call_operand.hbm [shape: bf16[2,8,128], index: 1, kind: input, shape index: {}]   ;;  %s550_s2 = inlined_call_operand.hbm [shape: f32[1,128], index: 2, kind: output, shape index: {}]  }
   0x1   :  { %8 = vsyncpa [#allocation6], 0 }
   0x2   :  { %9 = vsyncpa [#allocation4], 0  ;;  %s418_s9 = smov [#allocation2]   ;;  %s419_s11 = smov [#allocation5]  }
   0x3   :  { %s16_s10 = sshll.u32 %s418_s9, 4  ;;  %s25_s12 = sshll.u32 %s419_s11, 4  ;;  %s17_s10 = int_to_ptr.vmem [resolvable:$true] %s16_s10  ;;  %s441_s12 = int_to_ptr.vmem [resolvable:$true] %s25_s12 }
   0x4   :  { %s346_s15 = scalar_lea.hbm %s548_s0, 16 }
   0x5   :  { %p347_p0 = scmp.ne.s32.totalorder %s548_s0, %s346_s15  ;;  %p350_p1 = scmp.lt.u32.totalorder %s346_s15, %s548_s0 }
   0x7   :  { %p352_p2 = pnand %p350_p1, %p347_p0 }
   0x9   :  { %355 = shalt.err (!%p352_p2)
}
   0xa   :  { %s356_s20 = scalar_lea.vmem %s17_s10, 16  ;;  %s360_s21 = scalar_lea.vmem %s17_s10, 32 }
   0xb   :  { %p357_p3 = scmp.ne.s32.totalorder %s17_s10, %s356_s20  ;;  %p361_p4 = scmp.lt.s32.totalorder %s17_s10, %s17_s10 }
   0xc   :  { %p362_p5 = scmp.lt.s32.totalorder %s360_s21, %s356_s20 }
   0xe   :  { %p363_p6 = por %p362_p5, %p361_p4 }
  0x10   :  { %p364_p7 = pnand %p363_p6, %p357_p3 }
  0x12   :  { %367 = shalt.err (!%p364_p7)
}
  0x13   :  { %19 = dma.hbm_to_vmem [thread:$0]  %s548_s0, 16, %s17_s10, [#allocation3]  }
  0x14   :  { %s368_s26 = scalar_lea.hbm %s549_s1, 128 }
  0x15   :  { %p369_p8 = scmp.ne.s32.totalorder %s549_s1, %s368_s26  ;;  %p372_p9 = scmp.lt.u32.totalorder %s368_s26, %s549_s1 }
  0x17   :  { %p374_p10 = pnand %p372_p9, %p369_p8 }
  0x19   :  { %377 = shalt.err (!%p374_p10)
}
  0x1a   :  { %s378_s3 = scalar_lea.vmem %s441_s12, 128  ;;  %p383_p12 = scmp.lt.s32.totalorder %s441_s12, %s441_s12 }
  0x1b   :  { %p379_p11 = scmp.ne.s32.totalorder %s441_s12, %s378_s3  ;;  %p384_p13 = scmp.lt.s32.totalorder %s378_s3, %s378_s3 }
  0x1d   :  { %p385_p0 = por %p384_p13, %p383_p12 }
  0x1f   :  { %p386_p1 = pnand %p385_p0, %p379_p11 }
  0x21   :  { %389 = shalt.err (!%p386_p1)
}
  0x22   :  { %s420_s0 = smov 64   ;;  %s421_s4 = smov 4  }
  0x23   :  { %31 = dma.hbm_to_vmem [thread:$0]  %s549_s1, 128, %s441_s12, [#allocation6], %s420_s0, %s420_s0, %s421_s4  }
  0x24   :  { %412 = dma.done.wait [#allocation3], 16  }
  0x25   :  { %413 = vsyncadd [#allocation3], 4294967280 }
  0x26   :  { %414 = dma.done.wait [#allocation6], 128  }
  0x27   :  { %415 = vsyncadd [#allocation6], 4294967168  ;;  %v42_v0 = vlaneseq  ;;  %v422_v1 = vmov 0.0   ;;  %vm423_vm0 = vmmov 0   ;;  %v479_v4 = vld [vmem:[#allocation2] sm:$0x1] }
  0x28   :  { %297 = vmatprep.subr.bf16.mxu1 %v422_v1  ;;  %317 = vmatprep.subr.bf16.mxu0 %v422_v1  ;;  %v40_v5 = vand.u32 127, %v479_v4  ;;  %v424_v12 = vmov 1.0|1.0   ;;  %v121_v23 = vld [vmem:[#allocation5 + $0x4] sm:$0xf]  ;;  %v41_v25 = vshra.s32 %v479_v4, 7 }
  0x29   :  { %v474_v2 = vshrl.u32 %v42_v0, 7  ;;  %313 = vmatprep.mubr.msk.bf16.mxu1 %vm423_vm0, %v422_v1  ;;  %333 = vmatprep.mubr.msk.bf16.mxu0 %vm423_vm0, %v422_v1  ;;  %v119_v24 = vld [vmem:[#allocation5] sm:$0xf]  ;;  %s425_s1 = smov [#allocation7]  }
  0x2a   :  { %s221_s7 = sshll.u32 %s425_s1, 4  ;;  %s222_s7 = int_to_ptr.vmem [resolvable:$true] %s221_s7 }
  0x2b   :  { %v61_v3 = vsub.s32 0, %v474_v2  ;;  %v44_v6 = vadd.s32 8, %v474_v2  ;;  %v45_v7 = vadd.s32 16, %v474_v2  ;;  %v46_v8 = vadd.s32 24, %v474_v2  ;;  %s390_s8 = scalar_lea.vmem %s222_s7, 16  ;;  %s394_s9 = scalar_lea.vmem %s222_s7, 32 }
  0x2c   :  { %v47_v10 = vadd.s32 32, %v474_v2  ;;  %v48_v11 = vadd.s32 40, %v474_v2  ;;  %v49_v13 = vadd.s32 48, %v474_v2  ;;  %v50_v14 = vadd.s32 56, %v474_v2  ;;  %p391_p2 = scmp.ne.s32.totalorder %s222_s7, %s390_s8  ;;  %p395_p3 = scmp.lt.s32.totalorder %s222_s7, %s222_s7 }
  0x2d   :  { %v487_v9 = vrot.slane %v40_v5, %v61_v3  ;;  %v51_v15 = vadd.s32 64, %v474_v2  ;;  %v52_v16 = vadd.s32 72, %v474_v2  ;;  %v53_v17 = vadd.s32 80, %v474_v2  ;;  %p396_p4 = scmp.lt.s32.totalorder %s394_s9, %s390_s8 }
  0x2e   :  { %v54_v18 = vadd.s32 88, %v474_v2  ;;  %v55_v19 = vadd.s32 96, %v474_v2  ;;  %v56_v20 = vadd.s32 104, %v474_v2  ;;  %v57_v21 = vadd.s32 112, %v474_v2 }
  0x2f   :  { %vm63_vm1 = vcmp.eq.s32.totalorder %v474_v2, %v487_v9  ;;  %vm64_vm2 = vcmp.eq.s32.totalorder %v44_v6, %v487_v9  ;;  %vm65_vm3 = vcmp.eq.s32.totalorder %v45_v7, %v487_v9  ;;  %vm66_vm4 = vcmp.eq.s32.totalorder %v46_v8, %v487_v9  ;;  %p397_p5 = por %p396_p4, %p395_p3 }
  0x30   :  { %vm247_vm5 = vmpackc.low %vm64_vm2, %vm63_vm1  ;;  %vm67_vm7 = vcmp.eq.s32.totalorder %v47_v10, %v487_v9  ;;  %vm68_vm8 = vcmp.eq.s32.totalorder %v48_v11, %v487_v9  ;;  %vm69_vm10 = vcmp.eq.s32.totalorder %v49_v13, %v487_v9  ;;  %vm70_vm11 = vcmp.eq.s32.totalorder %v50_v14, %v487_v9 }
  0x31   :  { %298 = vmatpush3.bf16.msk.msra.mxu1 %vm247_vm5, %v424_v12  ;;  %318 = vmatpush3.bf16.msk.msra.mxu0 %vm247_vm5, %v424_v12  ;;  %vm249_vm6 = vmpackc.low %vm66_vm4, %vm65_vm3  ;;  %vm71_vm13 = vcmp.eq.s32.totalorder %v51_v15, %v487_v9  ;;  %vm72_vm14 = vcmp.eq.s32.totalorder %v52_v16, %v487_v9  ;;  %vm73_vm0 = vcmp.eq.s32.totalorder %v53_v17, %v487_v9  ;;  %v58_v22 = vadd.s32 120, %v474_v2  ;;  %p398_p6 = pnand %p397_p5, %p391_p2 }
  0x32   :  { %299 = vmatprep.subr.bf16.mxu1 %v422_v1  ;;  %319 = vmatprep.subr.bf16.mxu0 %v422_v1  ;;  %vm251_vm9 = vmpackc.low %vm68_vm8, %vm67_vm7  ;;  %vm74_vm1 = vcmp.eq.s32.totalorder %v54_v18, %v487_v9  ;;  %vm75_vm3 = vcmp.eq.s32.totalorder %v55_v19, %v487_v9  ;;  %vm76_vm4 = vcmp.eq.s32.totalorder %v56_v20, %v487_v9 }
  0x33   :  { %vm253_vm12 = vmpackc.low %vm70_vm11, %vm69_vm10  ;;  %vm78_vm7 = vcmp.eq.s32.totalorder %v58_v22, %v487_v9  ;;  %v205_v26 = vrot.slane %v41_v25, %v61_v3 }
  0x34   :  { %vm255_vm15 = vmpackc.low %vm72_vm14, %vm71_vm13 }
  0x35   :  { %300 = vmatpush3.bf16.msk.msra.mxu1 %vm249_vm6, %v424_v12  ;;  %320 = vmatpush3.bf16.msk.msra.mxu0 %vm249_vm6, %v424_v12  ;;  %vm257_vm2 = vmpackc.low %vm74_vm1, %vm73_vm0  ;;  %vm77_vm6 = vcmp.eq.s32.totalorder %v57_v21, %v487_v9 }
  0x36   :  { %301 = vmatprep.subr.bf16.mxu1 %v422_v1  ;;  %321 = vmatprep.subr.bf16.mxu0 %v422_v1  ;;  %vm259_vm5 = vmpackc.low %vm76_vm4, %vm75_vm3 }
  0x37   :  { %vm261_vm8 = vmpackc.low %vm78_vm7, %vm77_vm6 }
  0x39   :  { %302 = vmatpush3.bf16.msk.msra.mxu1 %vm251_vm9, %v424_v12  ;;  %322 = vmatpush3.bf16.msk.msra.mxu0 %vm251_vm9, %v424_v12  ;;  %vm206_vm9 = vcmp.eq.s32.totalorder %v474_v2, %v205_v26 }
  0x3a   :  { %303 = vmatprep.subr.bf16.mxu1 %v422_v1  ;;  %323 = vmatprep.subr.bf16.mxu0 %v422_v1 }
  0x3d   :  { %304 = vmatpush3.bf16.msk.msra.mxu1 %vm253_vm12, %v424_v12  ;;  %324 = vmatpush3.bf16.msk.msra.mxu0 %vm253_vm12, %v424_v12 }
  0x3e   :  { %305 = vmatprep.subr.bf16.mxu1 %v422_v1  ;;  %325 = vmatprep.subr.bf16.mxu0 %v422_v1 }
  0x41   :  { %306 = vmatpush3.bf16.msk.msra.mxu1 %vm255_vm15, %v424_v12  ;;  %326 = vmatpush3.bf16.msk.msra.mxu0 %vm255_vm15, %v424_v12 }
  0x42   :  { %307 = vmatprep.subr.bf16.mxu1 %v422_v1  ;;  %327 = vmatprep.subr.bf16.mxu0 %v422_v1 }
  0x45   :  { %308 = vmatpush3.bf16.msk.msra.mxu1 %vm257_vm2, %v424_v12  ;;  %328 = vmatpush3.bf16.msk.msra.mxu0 %vm257_vm2, %v424_v12 }
  0x46   :  { %309 = vmatprep.subr.bf16.mxu1 %v422_v1  ;;  %329 = vmatprep.subr.bf16.mxu0 %v422_v1 }
  0x49   :  { %310 = vmatpush3.bf16.msk.msra.mxu1 %vm259_vm5, %v424_v12  ;;  %330 = vmatpush3.bf16.msk.msra.mxu0 %vm259_vm5, %v424_v12 }
  0x4a   :  { %311 = vmatprep.subr.bf16.mxu1 %v422_v1  ;;  %331 = vmatprep.subr.bf16.mxu0 %v422_v1 }
  0x4d   :  { %312 = vmatpush3.bf16.msk.msra.mxu1 %vm261_vm8, %v424_v12  ;;  %332 = vmatpush3.bf16.msk.msra.mxu0 %vm261_vm8, %v424_v12 }
  0x50   :  { %314 = vmatmul.mubr.bf16.vlgmr.msra.gmra.mrb[0].mxu1 %v121_v23  ;;  %334 = vmatmul.mubr.bf16.vlgmr.msra.gmra.mrb[0].mxu0 %v119_v24 }
 0x123   :  { %v156_v27 = vpop.f32.mrb[0].mxu1  ;;  %v196_v28 = vpop.f32.mrb[0].mxu0 }
 0x124   :  { %v197_v29 = vadd.f32 %v196_v28, %v156_v27  ;;  %v315_v30 = vpop.f32.mrb[1].mxu1  ;;  %v335_v31 = vpop.f32.mrb[1].mxu0 }
 0x125   :  { %v159_v32 = vpop.f32.mrb[2].mxu1  ;;  %v199_v33 = vpop.f32.mrb[2].mxu0 }
 0x126   :  { %v207_v34 = vsel %vm206_vm9, %v197_v29, 0.0  ;;  %v316_v35 = vpop.f32.mrb[3].mxu1  ;;  %v336_v36 = vpop.f32.mrb[3].mxu0 }
 0x127   :  { %v208_v37 = vrot.slane %v207_v34, 4 }
 0x129   :  { %v209_v38 = vadd.f32 %v208_v37, %v207_v34 }
 0x12b   :  { %v210_v39 = vrot.slane %v209_v38, 2 }
 0x12d   :  { %v211_v40 = vadd.f32 %v210_v39, %v209_v38 }
 0x12f   :  { %v212_v41 = vrot.slane %v211_v40, 1 }
 0x131   :  { %v213_v42 = vadd.f32 %v212_v41, %v211_v40 }
 0x133   :  { %214 = vst [vmem:[#allocation7] sm:$0x1] %v213_v42 }
 0x134   :  { %401 = shalt.err (!%p398_p6)
}
 0x135   :  { %s402_s12 = scalar_lea.hbm %s550_s2, 16 }
 0x136   :  { %p403_p7 = scmp.ne.s32.totalorder %s550_s2, %s402_s12  ;;  %p406_p8 = scmp.lt.u32.totalorder %s402_s12, %s550_s2 }
 0x138   :  { %p408_p9 = pnand %p406_p8, %p403_p7 }
 0x13a   :  { %411 = shalt.err (!%p408_p9)
}
 0x13b   :  { %224 = dma.vmem_to_hbm [thread:$0]  %s222_s7, 16, %s550_s2, [#allocation4]  }
 0x13c   :  { %416 = dma.done.wait [#allocation4], 16  }
 0x13d   :  { %417 = vsyncadd [#allocation4], 4294967280 }
 0x13e   :  { %228 = vsyncpa [#allocation3], 1 }
 0x13f   :  { %229 = vsyncpa [#allocation6], 1 }
 0x140   :  { %230 = vsyncpa [#allocation4], 1 }

</bundles_post_ra>
